<compile_context>
chip_gen: v6e
topology: v6e:2x2x1
jax: 0.10.0
libtpu: 0.0.40
codegen_flags: <defaults>
</compile_context>

<pallas_src>
import jax
import jax.numpy as jnp
from jax import lax
from jax.experimental import pallas as pl
from jax.experimental.pallas import tpu as pltpu


def _round_up(x, m):
    return ((x + m - 1) // m) * m


_HI = lax.Precision.HIGHEST  # full-f32 MXU passes -> parity with f32 reference


def _proj_kernel(x_ref, w_ref, y_ref):
    """Y[k, row_tile] = X[row_tile] @ W_k^T   (PyTorch (H, F) weight layout)."""
    y_ref[0] = lax.dot_general(
        x_ref[...], w_ref[0],
        dimension_numbers=(((1,), (1,)), ((), ())),
        preferred_element_type=jnp.float32, precision=_HI,
    ).astype(y_ref.dtype)


def _agg_kernel(a_ref, y_ref, bsum_ref, alpha_ref, o_ref, acc_ref):
    """acc[row_tile] += A_k[row_tile, col_tile] @ Y_k[col_tile]; fused PReLU."""
    k = pl.program_id(1)
    j = pl.program_id(2)

    @pl.when((k == 0) & (j == 0))
    def _():
        acc_ref[...] = jnp.zeros_like(acc_ref)

    acc_ref[...] += jnp.dot(a_ref[0], y_ref[0],
                            preferred_element_type=jnp.float32, precision=_HI)

    @pl.when((k == pl.num_programs(1) - 1) & (j == pl.num_programs(2) - 1))
    def _():
        acc = acc_ref[...] + bsum_ref[...]          # sum_k b_k, added once
        alpha = alpha_ref[0]                        # PReLU slope (scalar, SMEM)
        o_ref[...] = jnp.where(acc > 0, acc, alpha * acc).astype(o_ref.dtype)


def _pick_tile(N, F_pad, H_pad, budget_bytes):
    """Largest 8-aligned row/contraction tile whose double-buffered working set
    fits a conservative scoped-VMEM budget (safe on v7x's 64 MiB)."""
    t = min(512, _round_up(N, 8))
    while t > 8:
        est = 4 * (2 * t * t            # A_k (row, col) tile, double-buffered
                   + 2 * t * F_pad      # X row tile (kernel 1)
                   + 2 * H_pad * F_pad  # W_k tile
                   + 4 * t * H_pad      # Y tile + output tile
                   + t * H_pad          # f32 accumulator scratch
                   + 2 * H_pad)         # bias-sum tile
        if est <= budget_bytes:
            break
        t = max(8, _round_up(t // 2, 8))
    return t


def sign_encoder(X, As, Ws, bs, alpha, *, tile=None,
                 vmem_budget_bytes=24 * 1024 * 1024):
    """SIGN encoder forward.

    X:     (N, F)        node features
    As:    (K+1, N, N)   dense stack of hop-k normalized adjacencies
    Ws:    (K+1, H, F)   per-hop nn.Linear weights (PyTorch layout)
    bs:    (K+1, H)      per-hop nn.Linear biases
    alpha: scalar        PReLU slope
    Returns (N, H).
    """
    N, F = X.shape
    Kp1, H, F_w = Ws.shape
    assert F_w == F and As.shape == (Kp1, N, N) and bs.shape == (Kp1, H)

    F_pad = _round_up(F, 128)   # lane-dense contraction dim
    H_pad = _round_up(H, 128)   # lane-dense output dim

    if tile is None:
        tile = _pick_tile(N, F_pad, H_pad, vmem_budget_bytes)
    assert tile % 8 == 0
    N_pad = _round_up(N, tile)
    # TODO(synk): if F_pad ever grows so large that one (tile, F_pad) X slab no
    # longer fits VMEM, add a contraction-tiling grid axis to the projection.

    f32 = jnp.float32
    Xp = jnp.pad(X.astype(f32), ((0, N_pad - N), (0, F_pad - F)))
    Ap = jnp.pad(As.astype(f32), ((0, 0), (0, N_pad - N), (0, N_pad - N)))
    Wp = jnp.pad(Ws.astype(f32), ((0, 0), (0, H_pad - H), (0, F_pad - F)))
    b_sum = jnp.pad(bs.astype(f32).sum(axis=0), (0, H_pad - H)).reshape(1, H_pad)
    alpha_arr = jnp.asarray(alpha, dtype=f32).reshape(1)

    n_tiles = N_pad // tile

    # ---- Kernel 1: per-hop feature projection  Y[k] = X @ W_k^T ------------
    Y = pl.pallas_call(
        _proj_kernel,
        out_shape=jax.ShapeDtypeStruct((Kp1, N_pad, H_pad), f32),
        grid_spec=pltpu.PrefetchScalarGridSpec(
            num_scalar_prefetch=0,
            grid=(Kp1, n_tiles),
            in_specs=[
                pl.BlockSpec((tile, F_pad), lambda k, i: (i, 0)),        # X rows
                pl.BlockSpec((1, H_pad, F_pad), lambda k, i: (k, 0, 0)),  # W_k
            ],
            out_specs=pl.BlockSpec((1, tile, H_pad), lambda k, i: (k, i, 0)),
        ),
        compiler_params=pltpu.CompilerParams(
            dimension_semantics=("parallel", "parallel"),
        ),
    )(Xp, Wp)

    # ---- Kernel 2: hop aggregation  out = PReLU(sum_k A_k @ Y_k + sum_k b_k)
    out = pl.pallas_call(
        _agg_kernel,
        out_shape=jax.ShapeDtypeStruct((N_pad, H_pad), X.dtype),
        grid_spec=pltpu.PrefetchScalarGridSpec(
            num_scalar_prefetch=0,
            grid=(n_tiles, Kp1, n_tiles),
            in_specs=[
                pl.BlockSpec((1, tile, tile), lambda i, k, j: (k, i, j)),   # A_k
                pl.BlockSpec((1, tile, H_pad), lambda i, k, j: (k, j, 0)),  # Y_k
                pl.BlockSpec((1, H_pad), lambda i, k, j: (0, 0)),           # sum_k b_k
                pl.BlockSpec(memory_space=pltpu.MemorySpace.SMEM),          # alpha
            ],
            out_specs=pl.BlockSpec((tile, H_pad), lambda i, k, j: (i, 0)),
            scratch_shapes=[pltpu.VMEM((tile, H_pad), jnp.float32)],
        ),
        compiler_params=pltpu.CompilerParams(
            dimension_semantics=("parallel", "arbitrary", "arbitrary"),
        ),
    )(Ap, Y, b_sum, alpha_arr)

    return out[:N, :H]


def _reference(X, As, Ws, bs, alpha):
    out = jnp.zeros((X.shape[0], Ws.shape[1]), dtype=jnp.float32)
    for k in range(As.shape[0]):
        tmp = jnp.matmul(As[k], X, precision=_HI)
        out = out + jnp.matmul(tmp, Ws[k].T, precision=_HI) + bs[k]
    return jnp.where(out > 0, out, alpha * out)


if __name__ == "__main__":
    # Small shapes consistent with the module: N nodes, in_dim F, hidden H, K hops.
    N, F, H, K = 20, 48, 32, 2
    key = jax.random.PRNGKey(0)
    k_adj, k_x, k_w, k_b = jax.random.split(key, 4)

    # Deterministic dense stand-in for preprocess_adj_sparse:
    # A_norm = D^-1/2 (A + I) D^-1/2, As[k] = A_norm^k.
    A = (jax.random.uniform(k_adj, (N, N)) < 0.3).astype(jnp.float32)
    A = jnp.maximum(A, A.T) * (1.0 - jnp.eye(N, dtype=jnp.float32))
    A_tilde = A + jnp.eye(N, dtype=jnp.float32)
    d_inv_sqrt = 1.0 / jnp.sqrt(A_tilde.sum(axis=1))
    A_norm = d_inv_sqrt[:, None] * A_tilde * d_inv_sqrt[None, :]
    As_list = [jnp.eye(N, dtype=jnp.float32)]
    for _ in range(K):
        As_list.append(As_list[-1] @ A_norm)
    As = jnp.stack(As_list)                                   # (K+1, N, N)

    X = jax.random.normal(k_x, (N, F), dtype=jnp.float32)

    # nn.Linear-style init: U(-1/sqrt(F), 1/sqrt(F)); PReLU default slope 0.25.
    bound = 1.0 / (F ** 0.5)
    Ws = jax.random.uniform(k_w, (K + 1, H, F), minval=-bound, maxval=bound,
                            dtype=jnp.float32)
    bs = jax.random.uniform(k_b, (K + 1, H), minval=-bound, maxval=bound,
                            dtype=jnp.float32)
    alpha = 0.25

    out = sign_encoder(X, As, Ws, bs, alpha)
    out = jax.block_until_ready(out)

    ref = _reference(X, As, Ws, bs, alpha)
    assert out.shape == (N, H)
    assert jnp.allclose(out, ref, atol=1e-4, rtol=1e-4), "mismatch vs reference"

    print("KERNEL_OK")
</pallas_src>

<mosaic_0001>
module attributes {stable_mosaic.version = 11 : i64} {
  func.func @_proj_kernel(%arg0: i32, %arg1: i32, %arg2: memref<24x128xf32, #tpu.memory_space<vmem>>, %arg3: memref<1x128x128xf32, #tpu.memory_space<vmem>>, %arg4: memref<1x24x128xf32, #tpu.memory_space<vmem>>) attributes {dimension_semantics = [#tpu.dimension_semantics<parallel>, #tpu.dimension_semantics<parallel>], iteration_bounds = array<i64: 3, 1>, scalar_prefetch = 0 : i64, scratch_operands = 0 : i64, tpu.core_type = #tpu.core_type<tc>, window_params = [{transform_indices = @transform_0, window_bounds = array<i64: 24, 128>}, {transform_indices = @transform_1, window_bounds = array<i64: 1, 128, 128>}, {transform_indices = @transform_2, window_bounds = array<i64: 1, 24, 128>}]} {
    %c0 = arith.constant 0 : index
    %c0_0 = arith.constant 0 : index
    %0 = vector.load %arg2[%c0, %c0_0] : memref<24x128xf32, #tpu.memory_space<vmem>>, vector<24x128xf32>
    %c0_1 = arith.constant 0 : index
    %c0_2 = arith.constant 0 : index
    %c0_3 = arith.constant 0 : index
    %1 = vector.load %arg3[%c0_1, %c0_2, %c0_3] : memref<1x128x128xf32, #tpu.memory_space<vmem>>, vector<1x128x128xf32>
    %2 = vector.shape_cast %1 : vector<1x128x128xf32> to vector<128x128xf32>
    %cst = arith.constant dense<0.000000e+00> : vector<24x128xf32>
    %3 = tpu.matmul %0, %2, %cst {dimension_numbers = #tpu.dot_dimension_numbers<[1], [1], [0], [0], [0, 0, 1, 0], [], []>, precision = #tpu.contract_precision<fp32>} : vector<24x128xf32>, vector<128x128xf32>, vector<24x128xf32> -> vector<24x128xf32>
    %c0_4 = arith.constant 0 : index
    %c0_5 = arith.constant 0 : index
    %c0_6 = arith.constant 0 : index
    %4 = vector.load %arg4[%c0_4, %c0_5, %c0_6] : memref<1x24x128xf32, #tpu.memory_space<vmem>>, vector<1x24x128xf32>
    %5 = vector.shape_cast %4 : vector<1x24x128xf32> to vector<24x128xf32>
    %6 = vector.shape_cast %3 : vector<24x128xf32> to vector<1x24x128xf32>
    tpu.vector_store %arg4[%c0_4, %c0_5, %c0_6], %6 {strides = array<i32>} : memref<1x24x128xf32, #tpu.memory_space<vmem>>, vector<1x24x128xf32>,
    return
  }
  func.func @transform_0(%arg0: i32, %arg1: i32) -> (i32, i32) {
    %c0_i32 = arith.constant 0 : i32
    %c0_i32_0 = arith.constant 0 : i32
    return %arg1, %c0_i32 : i32, i32
  }
  func.func @transform_1(%arg0: i32, %arg1: i32) -> (i32, i32, i32) {
    %c0_i32 = arith.constant 0 : i32
    %c0_i32_0 = arith.constant 0 : i32
    %c0_i32_1 = arith.constant 0 : i32
    return %arg0, %c0_i32, %c0_i32_0 : i32, i32, i32
  }
  func.func @transform_2(%arg0: i32, %arg1: i32) -> (i32, i32, i32) {
    %c0_i32 = arith.constant 0 : i32
    %c0_i32_0 = arith.constant 0 : i32
    return %arg0, %arg1, %c0_i32 : i32, i32, i32
  }
}

</mosaic_0001>

<bundles_post_ra>
// kernel: tpu_custom_call.1
= control target key start
LH: loop header
LB: loop body
LE: loop exit
PB: predicated region body
PF: predicated region fallthrough
CT: control target
= control target key end

     0   :  { %7 = vsyncpa [#allocation3], 0  ;;  %s2305_s0 = inlined_call_operand.hbm [shape: f32[24,128], index: 0, kind: input, shape index: {}]   ;;  %s2306_s1 = inlined_call_operand.hbm [shape: f32[3,128,128], index: 1, kind: input, shape index: {}]   ;;  %s2307_s2 = inlined_call_operand.hbm [shape: f32[3,24,128], index: 2, kind: output, shape index: {}]  }
   0x1   :  { %8 = vsyncpa [#allocation6], 0 }
   0x2   :  { %10 = vsyncpa [#allocation6 + $0x1], 0 }
   0x3   :  { %11 = vsyncpa [#allocation4], 0 }
   0x4   :  { %13 = vsyncpa [#allocation4 + $0x1], 0  ;;  %s1684_s9 = smov 0   ;;  %s1686_s10 = smov 0  }
   0x5   :  { %s1688_s11 = smov 0   ;;  %s1690_s12 = smov 0  }
   0x6   :  { %s1692_s13 = smov 0   ;;  %s1694_s14 = smov 0  }
   0x7 LB: > { %s1064_s15 = sadd.s32 4294967295, %s1658_s14   ;;  %s1065_s16 = sadd.s32 4294967294, %s1658_s14   ;;  %s1658_s14 = sphi %s1694_s14, %s19_s14   ;;  %s1654_s13 = sphi %s1692_s13, %s2332_s13   ;;  %s1650_s12 = sphi %s1690_s12, %s2331_s12   ;;  %s1646_s11 = sphi %s1688_s11, %s2330_s11   ;;  %s1642_s10 = sphi %s1686_s10, %s2329_s10   ;;  %s1638_s9 = sphi %s1684_s9, %s2328_s9  }
   0x8   : > { %p77_p0 = scmp.ne.s32.totalorder %s1642_s10, %s1638_s9  ;;  %p1718_p1 = scmp.eq.s32.totalorder %s1064_s15, 0 }
   0x9   : > { %p1722_p2 = scmp.eq.s32.totalorder %s1064_s15, 2  ;;  %p109_p3 = scmp.eq.s32.totalorder %s1065_s16, 2 }
   0xa   : > { %p1728_p4 = por %p1718_p1, %p77_p0  ;;  %p1066_p5 = scmp.ge.s32.totalorder %s1658_s14, 1 }
   0xb   : > { %p1733_p6 = por %p109_p3, %p77_p0  ;;  %p116_p7 = scmp.lt.s32.totalorder %s1658_s14, 4 }
   0xc   : > { %s1660_s22 = smov [#allocation2]   ;;  %s31_s25 = sadd.s32 1, %s1654_s13 }
   0xd   : > { %s2316_s20 = scalar_select %p1733_p6, 1, 0 }
   0xe   : > { %p1738_p8 = pnand %p1066_p5, %p116_p7  ;;  %s131_s23 = sshll.u32 %s1660_s22, 4  ;;  %s132_s23 = int_to_ptr.vmem [resolvable:$true] %s131_s23 }
   0xf   : > { %s1531_s26 = scalar_lea.vmem %s132_s23, 384  ;;  %p1539_p3 = scmp.lt.s32.totalorder %s132_s23, %s132_s23 }
  0x10   : > { %p1449_p9 = pneg %p1738_p8  ;;  %p1532_p12 = scmp.ne.s32.totalorder %s132_s23, %s1531_s26 }
  0x11   : > { %p1540_p5 = scmp.lt.s32.totalorder %s1531_s26, %s1531_s26 }
  0x12   : > { %p1746_p10 = pnand %p1449_p9, %p1718_p1 }
  0x13   : > { %p1541_p7 = por %p1540_p5, %p1539_p3 }
  0x14   : > { %p1522_p11 = pneg %p1746_p10 }
  0x16   : > { %p1534_p13 = pnand %p1532_p12, %p1522_p11 }
  0x18   : > { %p1535_p0 = pneg %p1534_p13 }
  0x1a   : > { %p1542_p6 = pnand %p1541_p7, %p1535_p0 }
  0x1c   : > { %1545 = shalt.err (!%p1542_p6)
}
  0x1d   : > { %s2308_s27 = smov 128   ;;  %s1662_s28 = smov 8  }
  0x1e   : > { %1452 = dma.hbm_to_vmem [thread:$0]  (!%p1746_p10), %s2305_s0, 384, %s132_s23, [#allocation3], %s2308_s27, %s2308_s27, %s1662_s28  }
  0x1f   : > { %p33_p6 = scmp.ge.s32.totalorder %s31_s25, 3  ;;  %s64_s3 = sadd.s32 1, %s1646_s11 }
  0x20   : > { %p71_p9 = scmp.ne.s32.totalorder %s1646_s11, %s1642_s10  ;;  %p72_p11 = scmp.eq.s32.totalorder %s1658_s14, 0 }
  0x21   : > { %s2334_s25 = smov (%p33_p6, %s31_s25), 0  ;;  %p1462_p0 = scmp.lt.s32.totalorder %s1658_s14, 3 }
  0x22   : > { %p1767_p12 = por %p72_p11, %p71_p9  ;;  %p1773_p13 = por %p1722_p2, %p71_p9 }
  0x23   : > { %s61_s6 = ssub.s32 %s1654_s13, %s2334_s25  ;;  %s145_s7 = sand.u32 1, %s1646_s11  }
  0x24   : > { %s2320_s5 = scalar_select %p1773_p13, 1, 0 }
  0x25   : > { %p62_p10 = scmp.eq.s32.totalorder %s61_s6, 0  ;;  %s1069_s8 = sshll.u32 %s145_s7, 7 }
  0x26   : > { %s1078_s16 = sshll.u32 %s1654_s13, 11  ;;  %s149_s26 = scalar_lea.vmem [#allocation5], %s1069_s8 }
  0x27   : > { %s1782_s15 = scalar_select %p62_p10, %s1646_s11, %s64_s3  }
  0x28   : > { %s155_s24 = scalar_lea.hbm %s2306_s1, %s1078_s16  ;;  %s156_s29 = sshll.u32 %s149_s26, 4  ;;  %s157_s29 = int_to_ptr.vmem [resolvable:$true] %s156_s29 }
  0x29   : > { %p1790_p2 = pnand %p1462_p0, %p1767_p12  ;;  %s146_s30 = scalar_lea.sflag [#allocation6], %s145_s7 }
  0x2a   : > { %s1559_s6 = scalar_lea.vmem %s157_s29, 2048  ;;  %s1663_s3 = smov [#allocation5]  }
  0x2b   : > { %p1548_p3 = pneg %p1790_p2  ;;  %p1560_p5 = scmp.ne.s32.totalorder %s157_s29, %s1559_s6 }
  0x2c   : > { %s1564_s27 = sshll.u32 %s1663_s3, 4  ;;  %s1565_s27 = int_to_ptr.vmem [resolvable:$false] %s1564_s27 }
  0x2d   : > { %p1562_p7 = pnand %p1560_p5, %p1548_p3  ;;  %s1566_s16 = scalar_lea.vmem %s1565_s27, 4096 }
  0x2e   : > { %p1567_p9 = scmp.lt.s32.totalorder %s157_s29, %s1565_s27  ;;  %p1568_p11 = scmp.lt.s32.totalorder %s1566_s16, %s1559_s6 }
  0x2f   : > { %p1563_p6 = pneg %p1562_p7 }
  0x30   : > { %p1569_p10 = por %p1568_p11, %p1567_p9 }
  0x32   : > { %p1570_p13 = pnand %p1569_p10, %p1563_p6 }
  0x34   : > { %1573 = shalt.err (!%p1570_p13)
}
  0x35   : > { %s2322_s4 = smov 128   ;;  %168 = sbr.rel (%p1738_p8) target bundleno = 482 (0x1e2), region = 28 }
  0x36   : > { %1456 = dma.hbm_to_vmem [thread:$0]  (!%p1790_p2), %s155_s24, 2048, %s157_s29, %s146_s30, %s2322_s4, %s2322_s4, %s1662_s28  }
  0x3a   : > { %1625 = dma.done.wait (%p1718_p1), [#allocation3], 384  }
  0x3b   : > { %1627 = vsyncadd (%p1718_p1), [#allocation3], 4294966912  ;;  %s1808_s27 = sand.u32 1, %s1642_s10  }
  0x3c   : > { %s1074_s7 = sshll.u32 %s1808_s27, 7  ;;  %s175_s8 = scalar_lea.sflag [#allocation6], %s1808_s27 }
  0x3d   : > { %s1812_s22 = scalar_lea.vmem [#allocation5], %s1074_s7 }
  0x3e   : > { %1629 = dma.done.wait (%p1728_p4), %s175_s8, 2048  }
  0x3f   : > { %1631 = vsyncadd (%p1728_p4), %s175_s8, 4294965248  ;;  %v1664_v0 = vmov 0.0   ;;  %vm1665_vm0 = vmmov 0   ;;  %v219_v1 = vld [vmem:[%s1812_s22 + $0x78] sm:$0xff]  ;;  %v218_v2 = vld [vmem:[%s1812_s22 + $0x70] sm:$0xff]  ;;  %s1439_s17 = smul.u32 24, %s1808_s27 }
  0x40   : > { %1193 = vmatprep.subr.mxu0 %v1664_v0  ;;  %1234 = vmatprep.subr.mxu1 %v1664_v0  ;;  %v217_v3 = vld [vmem:[%s1812_s22 + $0x68] sm:$0xff]  ;;  %v1827_v4 = vand.u32 4294901760, %v219_v1  ;;  %v1829_v5 = vand.u32 4294901760, %v218_v2  ;;  %v216_v7 = vld [vmem:[%s1812_s22 + $0x60] sm:$0xff]  ;;  %v215_v11 = vld [vmem:[%s1812_s22 + $0x58] sm:$0xff]  ;;  %s1440_s28 = smul.u32 384, %s1650_s12 }
  0x41   : > { %1225 = vmatprep.mubr.msk.f32.mxu0 %vm1665_vm0, %v1664_v0  ;;  %1266 = vmatprep.mubr.msk.f32.mxu1 %vm1665_vm0, %v1664_v0  ;;  %v1831_v6 = vand.u32 4294901760, %v217_v3  ;;  %v1838_v9 = vand.u32 4294901760, %v216_v7  ;;  %v1850_v15 = vand.u32 4294901760, %v215_v11  ;;  %v214_v19 = vld [vmem:[%s1812_s22 + $0x50] sm:$0xff]  ;;  %v213_v26 = vld [vmem:[%s1812_s22 + $0x48] sm:$0xff]  ;;  %v212_v32 = vld [vmem:[%s1812_s22 + $0x40] sm:$0xff] }
  0x42   : > { %1194 = vmatpush3.xpose.msra.mxu0 %v1827_v4  ;;  %v1836_v8 = vsub.f32 %v219_v1, %v1827_v4  ;;  %v1841_v10 = vsub.f32 %v218_v2, %v1829_v5  ;;  %v1865_v22 = vand.u32 4294901760, %v214_v19  ;;  %v1878_v28 = vand.u32 4294901760, %v213_v26  ;;  %v211_v38 = vld [vmem:[%s1812_s22 + $0x38] sm:$0xff]  ;;  %v210_v44 = vld [vmem:[%s1812_s22 + $0x30] sm:$0xff]  ;;  %v209_v50 = vld [vmem:[%s1812_s22 + $0x28] sm:$0xff]  ;;  %s198_s19 = scalar_lea.vmem [#allocation7], %s1439_s17  ;;  %s2258_s26 = scalar_lea.hbm %s2307_s2, %s1440_s28 }
  0x43   : > { %v1845_v12 = vsub.f32 %v217_v3, %v1831_v6  ;;  %1195 = vmatprep.subr.mxu0 %v1664_v0  ;;  %v1862_v20 = vsub.f32 %v216_v7, %v1838_v9  ;;  %v1874_v27 = vsub.f32 %v215_v11, %v1850_v15  ;;  %v1891_v34 = vand.u32 4294901760, %v212_v32  ;;  %v208_v56 = vld [vmem:[%s1812_s22 + $0x20] sm:$0xff]  ;;  %v207_v62 = vld [vmem:[%s1812_s22 + $0x18] sm:$0xff]  ;;  %v206_v11 = vld [vmem:[%s1812_s22 + $0x10] sm:$0xff]  ;;  %s966_s21 = sshll.u32 %s198_s19, 4  ;;  %s951_s12 = scalar_lea.sflag [#allocation4], %s1808_s27  ;;  %s2253_s21 = int_to_ptr.vmem [resolvable:$true] %s966_s21 }
  0x44   : > { %v334_v13 = vand.u32 4294901760, %v1836_v8  ;;  %v341_v14 = vand.u32 4294901760, %v1841_v10  ;;  %v1887_v33 = vsub.f32 %v214_v19, %v1865_v22  ;;  %v1900_v39 = vsub.f32 %v213_v26, %v1878_v28  ;;  %s1574_s29 = scalar_lea.vmem %s2253_s21, 384  ;;  %p2326_p4 = scmp.ne.s32.totalorder %s2320_s5, 0 }
  0x45   : > { %v348_v18 = vand.u32 4294901760, %v1845_v12  ;;  %v355_v25 = vand.u32 4294901760, %v1862_v20  ;;  %v362_v31 = vand.u32 4294901760, %v1874_v27  ;;  %v1904_v40 = vand.u32 4294901760, %v211_v38  ;;  %p1575_p1 = scmp.ne.s32.totalorder %s2253_s21, %s1574_s29  ;;  %s1666_s18 = smov [#allocation7]  }
  0x46   : > { %1196 = vmatpush3.xpose.msra.mxu0 %v1829_v5  ;;  %v335_v16 = vsub.f32 %v1836_v8, %v334_v13  ;;  %v342_v17 = vsub.f32 %v1841_v10, %v341_v14  ;;  %v369_v37 = vand.u32 4294901760, %v1887_v33  ;;  %v376_v43 = vand.u32 4294901760, %v1900_v39  ;;  %s1578_s30 = sshll.u32 %s1666_s18, 4  ;;  %s1579_s30 = int_to_ptr.vmem [resolvable:$false] %s1578_s30 }
  0x47   : > { %1197 = vmatprep.subr.mxu0 %v1664_v0  ;;  %v349_v24 = vsub.f32 %v1845_v12, %v348_v18  ;;  %v356_v30 = vsub.f32 %v1862_v20, %v355_v25  ;;  %v363_v36 = vsub.f32 %v1874_v27, %v362_v31  ;;  %v1913_v45 = vsub.f32 %v212_v32, %v1891_v34  ;;  %p1576_p8 = pnand %p1575_p1, %p2326_p4  ;;  %s1580_s6 = scalar_lea.vmem %s1579_s30, 768 }
  0x48   : > { %v336_v21 = vand.u32 4294901760, %v335_v16  ;;  %v343_v23 = vand.u32 4294901760, %v342_v17  ;;  %v370_v42 = vsub.f32 %v1887_v33, %v369_v37  ;;  %v1917_v46 = vand.u32 4294901760, %v210_v44  ;;  %p1581_p13 = scmp.lt.s32.totalorder %s2253_s21, %s1579_s30  ;;  %p1582_p0 = scmp.lt.s32.totalorder %s1580_s6, %s1574_s29 }
  0x49   : > { %v350_v29 = vand.u32 4294901760, %v349_v24  ;;  %v357_v35 = vand.u32 4294901760, %v356_v30  ;;  %v364_v41 = vand.u32 4294901760, %v363_v36  ;;  %v377_v48 = vsub.f32 %v1900_v39, %v376_v43  ;;  %v205_v24 = vld [vmem:[%s1812_s22 + $0x8] sm:$0xff]  ;;  %p1577_p12 = pneg %p1576_p8 }
  0x4a   : > { %1198 = vmatpush3.xpose.msra.mxu0 %v1831_v6  ;;  %1235 = vmatpush3.xpose.msra.mxu1 %v336_v21  ;;  %v371_v47 = vand.u32 4294901760, %v370_v42  ;;  %v383_v49 = vand.u32 4294901760, %v1913_v45  ;;  %v1926_v51 = vsub.f32 %v211_v38, %v1904_v40  ;;  %v1930_v52 = vand.u32 4294901760, %v209_v50  ;;  %p1583_p2 = por %p1582_p0, %p1581_p13 }
  0x4b   : > { %1199 = vmatprep.subr.mxu0 %v1664_v0  ;;  %1236 = vmatprep.subr.mxu1 %v1664_v0  ;;  %v378_v53 = vand.u32 4294901760, %v377_v48  ;;  %v1939_v57 = vsub.f32 %v210_v44, %v1917_v46  ;;  %v1943_v58 = vand.u32 4294901760, %v208_v56  ;;  %v1956_v1 = vand.u32 4294901760, %v207_v62  ;;  %v202_v44 = vld [vmem:[#allocation2 + $0x8] sm:$0xff] }
  0x4c   : > { %v384_v54 = vsub.f32 %v1913_v45, %v383_v49  ;;  %v390_v55 = vand.u32 4294901760, %v1926_v51  ;;  %v1952_v63 = vsub.f32 %v209_v50, %v1930_v52  ;;  %v1969_v17 = vand.u32 4294901760, %v206_v11  ;;  %p1584_p3 = pnand %p1583_p2, %p1577_p12 }
  0x4d   : > { %v397_v61 = vand.u32 4294901760, %v1939_v57  ;;  %v1965_v16 = vsub.f32 %v208_v56, %v1943_v58  ;;  %v1978_v26 = vsub.f32 %v207_v62, %v1956_v1  ;;  %v1982_v30 = vand.u32 4294901760, %v205_v24 }
  0x4e   : > { %1200 = vmatpush3.xpose.msra.mxu0 %v1838_v9  ;;  %1237 = vmatpush3.xpose.msra.mxu1 %v343_v23  ;;  %v385_v59 = vand.u32 4294901760, %v384_v54  ;;  %v391_v60 = vsub.f32 %v1926_v51, %v390_v55  ;;  %v404_v7 = vand.u32 4294901760, %v1952_v63  ;;  %v1993_v42 = vsub.f32 %v206_v11, %v1969_v17 }
  0x4f   : > { %1201 = vmatprep.subr.mxu0 %v1664_v0  ;;  %1238 = vmatprep.subr.mxu1 %v1664_v0  ;;  %v398_v3 = vsub.f32 %v1939_v57, %v397_v61  ;;  %v411_v23 = vand.u32 4294901760, %v1965_v16  ;;  %v2312_v38 = vand.u32 4294901760, %v1978_v26  ;;  %v2002_v50 = vand.u32 4294901760, %v202_v44 }
  0x50   : > { %v392_v2 = vand.u32 4294901760, %v391_v60  ;;  %v405_v21 = vsub.f32 %v1952_v63, %v404_v7  ;;  %v2310_v56 = vand.u32 4294901760, %v1993_v42  ;;  %v203_v60 = vld [vmem:[#allocation2 + $0x10] sm:$0xff] }
  0x51   : > { %v399_v19 = vand.u32 4294901760, %v398_v3  ;;  %v412_v36 = vsub.f32 %v1965_v16, %v411_v23  ;;  %v419_v54 = vsub.f32 %v1978_v26, %v2312_v38  ;;  %v2018_v3 = vand.u32 4294901760, %v203_v60 }
  0x52   : > { %1202 = vmatpush3.xpose.msra.mxu0 %v1850_v15  ;;  %1239 = vmatpush3.xpose.msra.mxu1 %v350_v29  ;;  %v201_v29 = vld [vmem:[#allocation2] sm:$0xff] }
  0x53   : > { %1203 = vmatprep.subr.mxu0 %v1664_v0  ;;  %1240 = vmatprep.subr.mxu1 %v1664_v0  ;;  %v1984_v32 = vand.u32 4294901760, %v201_v29  ;;  %v420_v11 = vand.u32 4294901760, %v419_v54 }
  0x55   : > { %v2000_v48 = vsub.f32 %v201_v29, %v1984_v32 }
  0x56   : > { %1204 = vmatpush3.xpose.msra.mxu0 %v1865_v22  ;;  %1241 = vmatpush3.xpose.msra.mxu1 %v357_v35  ;;  %v406_v35 = vand.u32 4294901760, %v405_v21 }
  0x57   : > { %1205 = vmatprep.subr.mxu0 %v1664_v0  ;;  %1242 = vmatprep.subr.mxu1 %v1664_v0  ;;  %v303_v62 = vand.u32 4294901760, %v2000_v48 }
  0x59   : > { %v304_v29 = vsub.f32 %v2000_v48, %v303_v62 }
  0x5a   : > { %1206 = vmatpush3.xpose.msra.mxu0 %v1878_v28  ;;  %1243 = vmatpush3.xpose.msra.mxu1 %v364_v41  ;;  %v204_v41 = vld [vmem:[%s1812_s22] sm:$0xff] }
  0x5b   : > { %1207 = vmatprep.subr.mxu0 %v1664_v0  ;;  %1244 = vmatprep.subr.mxu1 %v1664_v0  ;;  %v305_v54 = vand.u32 4294901760, %v304_v29 }
  0x5e   : > { %1208 = vmatpush3.xpose.msra.mxu0 %v1891_v34  ;;  %1245 = vmatpush3.xpose.msra.mxu1 %v371_v47  ;;  %v1997_v47 = vand.u32 4294901760, %v204_v41 }
  0x5f   : > { %1209 = vmatprep.subr.mxu0 %v1664_v0  ;;  %1246 = vmatprep.subr.mxu1 %v1664_v0 }
  0x62   : > { %1210 = vmatpush3.xpose.msra.mxu0 %v1904_v40  ;;  %1247 = vmatpush3.xpose.msra.mxu1 %v378_v53  ;;  %v413_v53 = vand.u32 4294901760, %v412_v36  ;;  %v2035_v36 = vsub.f32 %v203_v60, %v2018_v3 }
  0x63   : > { %1211 = vmatprep.subr.mxu0 %v1664_v0  ;;  %1248 = vmatprep.subr.mxu1 %v1664_v0 }
  0x66   : > { %1212 = vmatpush3.xpose.msra.mxu0 %v1917_v46  ;;  %1249 = vmatpush3.xpose.msra.mxu1 %v385_v59  ;;  %v2010_v59 = vsub.f32 %v205_v24, %v1982_v30  ;;  %v2026_v24 = vsub.f32 %v204_v41, %v1997_v47 }
  0x67   : > { %1213 = vmatprep.subr.mxu0 %v1664_v0  ;;  %1250 = vmatprep.subr.mxu1 %v1664_v0 }
  0x68   : > { %v2311_v21 = vand.u32 4294901760, %v2010_v59 }
  0x6a   : > { %1214 = vmatpush3.xpose.msra.mxu0 %v1930_v52  ;;  %1251 = vmatpush3.xpose.msra.mxu1 %v392_v2  ;;  %v2016_v2 = vsub.f32 %v202_v44, %v2002_v50  ;;  %v433_v41 = vsub.f32 %v2010_v59, %v2311_v21 }
  0x6b   : > { %1215 = vmatprep.subr.mxu0 %v1664_v0  ;;  %1252 = vmatprep.subr.mxu1 %v1664_v0 }
  0x6e   : > { %1216 = vmatpush3.xpose.msra.mxu0 %v1943_v58  ;;  %1253 = vmatpush3.xpose.msra.mxu1 %v399_v19  ;;  %v426_v19 = vsub.f32 %v1993_v42, %v2310_v56  ;;  %v323_v56 = vand.u32 4294901760, %v2035_v36 }
  0x6f   : > { %1217 = vmatprep.subr.mxu0 %v1664_v0  ;;  %1254 = vmatprep.subr.mxu1 %v1664_v0 }
  0x70   : > { %v427_v44 = vand.u32 4294901760, %v426_v19  ;;  %v324_v21 = vsub.f32 %v2035_v36, %v323_v56 }
  0x72   : > { %1218 = vmatpush3.xpose.msra.mxu0 %v1956_v1  ;;  %1255 = vmatpush3.xpose.msra.mxu1 %v406_v35  ;;  %v313_v35 = vand.u32 4294901760, %v2016_v2 }
  0x73   : > { %1219 = vmatprep.subr.mxu0 %v1664_v0  ;;  %1256 = vmatprep.subr.mxu1 %v1664_v0 }
  0x74   : > { %v314_v60 = vsub.f32 %v2016_v2, %v313_v35 }
  0x76   : > { %1220 = vmatpush3.xpose.msra.mxu0 %v1969_v17  ;;  %1257 = vmatpush3.xpose.msra.mxu1 %v413_v53  ;;  %v439_v53 = vand.u32 4294901760, %v2026_v24  ;;  %v315_v29 = vand.u32 4294901760, %v314_v60 }
  0x77   : > { %1221 = vmatprep.subr.mxu0 %v1664_v0  ;;  %1258 = vmatprep.subr.mxu1 %v1664_v0 }
  0x78   : > { %v440_v19 = vsub.f32 %v2026_v24, %v439_v53 }
  0x7a   : > { %1222 = vmatpush3.xpose.msra.mxu0 %v1982_v30  ;;  %1259 = vmatpush3.xpose.msra.mxu1 %v420_v11  ;;  %v434_v11 = vand.u32 4294901760, %v433_v41  ;;  %v441_v38 = vand.u32 4294901760, %v440_v19 }
  0x7b   : > { %1223 = vmatprep.subr.mxu0 %v1664_v0  ;;  %1260 = vmatprep.subr.mxu1 %v1664_v0 }
  0x7e   : > { %1224 = vmatpush3.xpose.msra.mxu0 %v1997_v47  ;;  %1261 = vmatpush3.xpose.msra.mxu1 %v427_v44  ;;  %v325_v44 = vand.u32 4294901760, %v324_v21 }
  0x7f   : > { %1262 = vmatprep.subr.mxu1 %v1664_v0  ;;  %1275 = vmatprep.subr.mxu0 %v1664_v0 }
  0x81   : > { %1226 = vmatmul.mubr.f32.vlgmr.msra.gmra.mxu0 %v305_v54 }
  0x82   : > { %1263 = vmatpush3.xpose.msra.mxu1 %v434_v11  ;;  %1276 = vmatpush3.xpose.msra.mxu0 %v1836_v8 }
  0x83   : > { %1264 = vmatprep.subr.mxu1 %v1664_v0  ;;  %1277 = vmatprep.subr.mxu0 %v1664_v0 }
  0x84   : > { %1228 = vmatprep.mubr.msk.f32.mxu0 %vm1665_vm0, %v1664_v0 }
  0x85   : > { %1229 = vmatmul.mubr.f32.gmra.mxu0 %v315_v29 }
  0x86   : > { %1265 = vmatpush3.xpose.msra.mxu1 %v441_v38  ;;  %1278 = vmatpush3.xpose.msra.mxu0 %v1841_v10 }
  0x87   : > { %1279 = vmatprep.subr.mxu0 %v1664_v0  ;;  %1316 = vmatprep.subr.mxu1 %v1664_v0 }
  0x88   : > { %1231 = vmatprep.mubr.msk.f32.mxu0 %vm1665_vm0, %v1664_v0 }
  0x89   : > { %1267 = vmatmul.mubr.f32.vlgmr.msra.gmra.mxu1 %v1984_v32  ;;  %1232 = vmatmul.mubr.f32.gmra.mxu0 %v325_v44 }
  0x8a   : > { %1280 = vmatpush3.xpose.msra.mxu0 %v1845_v12  ;;  %1317 = vmatpush3.xpose.msra.mxu1 %v1827_v4 }
  0x8b   : > { %1281 = vmatprep.subr.mxu0 %v1664_v0  ;;  %1318 = vmatprep.subr.mxu1 %v1664_v0 }
  0x8c   : > { %1269 = vmatprep.mubr.msk.f32.mxu1 %vm1665_vm0, %v1664_v0  ;;  %1307 = vmatprep.mubr.msk.f32.mxu0 %vm1665_vm0, %v1664_v0 }
  0x8d   : > { %1270 = vmatmul.mubr.f32.gmra.mxu1 %v2002_v50 }
  0x8e   : > { %1282 = vmatpush3.xpose.msra.mxu0 %v1862_v20  ;;  %1319 = vmatpush3.xpose.msra.mxu1 %v1829_v5 }
  0x8f   : > { %1283 = vmatprep.subr.mxu0 %v1664_v0  ;;  %1320 = vmatprep.subr.mxu1 %v1664_v0 }
  0x90   : > { %1272 = vmatprep.mubr.msk.f32.mxu1 %vm1665_vm0, %v1664_v0 }
  0x91   : > { %1273 = vmatmul.mubr.f32.gmra.mxu1 %v2018_v3 }
  0x92   : > { %1284 = vmatpush3.xpose.msra.mxu0 %v1874_v27  ;;  %1321 = vmatpush3.xpose.msra.mxu1 %v1831_v6 }
  0x93   : > { %1285 = vmatprep.subr.mxu0 %v1664_v0  ;;  %1322 = vmatprep.subr.mxu1 %v1664_v0 }
  0x94   : > { %1348 = vmatprep.mubr.msk.f32.mxu1 %vm1665_vm0, %v1664_v0 }
  0x96   : > { %1286 = vmatpush3.xpose.msra.mxu0 %v1887_v33  ;;  %1323 = vmatpush3.xpose.msra.mxu1 %v1838_v9 }
  0x97   : > { %1287 = vmatprep.subr.mxu0 %v1664_v0  ;;  %1324 = vmatprep.subr.mxu1 %v1664_v0 }
  0x9a   : > { %1288 = vmatpush3.xpose.msra.mxu0 %v1900_v39  ;;  %1325 = vmatpush3.xpose.msra.mxu1 %v1850_v15 }
  0x9b   : > { %1289 = vmatprep.subr.mxu0 %v1664_v0  ;;  %1326 = vmatprep.subr.mxu1 %v1664_v0 }
  0x9e   : > { %1290 = vmatpush3.xpose.msra.mxu0 %v1913_v45  ;;  %1327 = vmatpush3.xpose.msra.mxu1 %v1865_v22 }
  0x9f   : > { %1291 = vmatprep.subr.mxu0 %v1664_v0  ;;  %1328 = vmatprep.subr.mxu1 %v1664_v0 }
  0xa2   : > { %1292 = vmatpush3.xpose.msra.mxu0 %v1926_v51  ;;  %1329 = vmatpush3.xpose.msra.mxu1 %v1878_v28 }
  0xa3   : > { %1293 = vmatprep.subr.mxu0 %v1664_v0  ;;  %1330 = vmatprep.subr.mxu1 %v1664_v0 }
  0xa6   : > { %1294 = vmatpush3.xpose.msra.mxu0 %v1939_v57  ;;  %1331 = vmatpush3.xpose.msra.mxu1 %v1891_v34 }
  0xa7   : > { %1295 = vmatprep.subr.mxu0 %v1664_v0  ;;  %1332 = vmatprep.subr.mxu1 %v1664_v0 }
  0xaa   : > { %1296 = vmatpush3.xpose.msra.mxu0 %v1952_v63  ;;  %1333 = vmatpush3.xpose.msra.mxu1 %v1904_v40 }
  0xab   : > { %1297 = vmatprep.subr.mxu0 %v1664_v0  ;;  %1334 = vmatprep.subr.mxu1 %v1664_v0 }
  0xae   : > { %1298 = vmatpush3.xpose.msra.mxu0 %v1965_v16  ;;  %1335 = vmatpush3.xpose.msra.mxu1 %v1917_v46 }
  0xaf   : > { %1299 = vmatprep.subr.mxu0 %v1664_v0  ;;  %1336 = vmatprep.subr.mxu1 %v1664_v0 }
  0xb2   : > { %1300 = vmatpush3.xpose.msra.mxu0 %v1978_v26  ;;  %1337 = vmatpush3.xpose.msra.mxu1 %v1930_v52 }
  0xb3   : > { %1301 = vmatprep.subr.mxu0 %v1664_v0  ;;  %1338 = vmatprep.subr.mxu1 %v1664_v0 }
  0xb6   : > { %1302 = vmatpush3.xpose.msra.mxu0 %v1993_v42  ;;  %1339 = vmatpush3.xpose.msra.mxu1 %v1943_v58 }
  0xb7   : > { %1303 = vmatprep.subr.mxu0 %v1664_v0  ;;  %1340 = vmatprep.subr.mxu1 %v1664_v0 }
  0xba   : > { %1304 = vmatpush3.xpose.msra.mxu0 %v2010_v59  ;;  %1341 = vmatpush3.xpose.msra.mxu1 %v1956_v1 }
  0xbb   : > { %1305 = vmatprep.subr.mxu0 %v1664_v0  ;;  %1342 = vmatprep.subr.mxu1 %v1664_v0 }
  0xbe   : > { %1306 = vmatpush3.xpose.msra.mxu0 %v2026_v24  ;;  %1343 = vmatpush3.xpose.msra.mxu1 %v1969_v17 }
  0xbf   : > { %1344 = vmatprep.subr.mxu1 %v1664_v0  ;;  %1357 = vmatprep.subr.mxu0 %v1664_v0 }
  0xc1   : > { %1308 = vmatmul.mubr.f32.vlgmr.msra.gmra.mxu0 %v2000_v48 }
  0xc2   : > { %1345 = vmatpush3.xpose.msra.mxu1 %v1982_v30  ;;  %1358 = vmatpush3.xpose.msra.mxu0 %v334_v13 }
  0xc3   : > { %1310 = vmatprep.mubr.msk.f32.mxu0 %vm1665_vm0, %v1664_v0  ;;  %1346 = vmatprep.subr.mxu1 %v1664_v0 }
  0xc4   : > { %1359 = vmatprep.subr.mxu0 %v1664_v0 }
  0xc5   : > { %1311 = vmatmul.mubr.f32.gmra.mxu0 %v2016_v2 }
  0xc6   : > { %1347 = vmatpush3.xpose.msra.mxu1 %v1997_v47  ;;  %1360 = vmatpush3.xpose.msra.mxu0 %v341_v14 }
  0xc7   : > { %1313 = vmatprep.mubr.msk.f32.mxu0 %vm1665_vm0, %v1664_v0  ;;  %1361 = vmatprep.subr.mxu0 %v1664_v0 }
  0xc8   : > { %1398 = vmatprep.subr.mxu1 %v1664_v0 }
  0xc9   : > { %1314 = vmatmul.mubr.f32.gmra.mxu0 %v2035_v36  ;;  %1349 = vmatmul.mubr.f32.vlgmr.msra.gmra.mxu1 %v303_v62 }
  0xca   : > { %1362 = vmatpush3.xpose.msra.mxu0 %v348_v18  ;;  %1399 = vmatpush3.xpose.msra.mxu1 %v1827_v4  ;;  %v2323_v4 = vand.u32 4294901760, %v1978_v26 }
  0xcb   : > { %1351 = vmatprep.mubr.msk.f32.mxu1 %vm1665_vm0, %v1664_v0  ;;  %1363 = vmatprep.subr.mxu0 %v1664_v0 }
  0xcc   : > { %1400 = vmatprep.subr.mxu1 %v1664_v0  ;;  %1389 = vmatprep.mubr.msk.f32.mxu0 %vm1665_vm0, %v1664_v0 }
  0xcd   : > { %1352 = vmatmul.mubr.f32.gmra.mxu1 %v313_v35 }
  0xce   : > { %1364 = vmatpush3.xpose.msra.mxu0 %v355_v25  ;;  %1401 = vmatpush3.xpose.msra.mxu1 %v1829_v5  ;;  %v2324_v5 = vand.u32 4294901760, %v1993_v42 }
  0xcf   : > { %1354 = vmatprep.mubr.msk.f32.mxu1 %vm1665_vm0, %v1664_v0  ;;  %1365 = vmatprep.subr.mxu0 %v1664_v0 }
  0xd0   : > { %1402 = vmatprep.subr.mxu1 %v1664_v0 }
  0xd1   : > { %1355 = vmatmul.mubr.f32.gmra.mxu1 %v323_v56 }
  0xd2   : > { %1366 = vmatpush3.xpose.msra.mxu0 %v362_v31  ;;  %1403 = vmatpush3.xpose.msra.mxu1 %v1831_v6  ;;  %v2325_v6 = vand.u32 4294901760, %v2010_v59 }
  0xd3   : > { %1367 = vmatprep.subr.mxu0 %v1664_v0  ;;  %1404 = vmatprep.subr.mxu1 %v1664_v0 }
  0xd4   : > { %1430 = vmatprep.mubr.msk.f32.mxu1 %vm1665_vm0, %v1664_v0 }
  0xd6   : > { %1368 = vmatpush3.xpose.msra.mxu0 %v369_v37  ;;  %1405 = vmatpush3.xpose.msra.mxu1 %v1838_v9 }
  0xd7   : > { %1369 = vmatprep.subr.mxu0 %v1664_v0  ;;  %1406 = vmatprep.subr.mxu1 %v1664_v0 }
  0xda   : > { %1370 = vmatpush3.xpose.msra.mxu0 %v376_v43  ;;  %1407 = vmatpush3.xpose.msra.mxu1 %v1850_v15 }
  0xdb   : > { %1371 = vmatprep.subr.mxu0 %v1664_v0  ;;  %1408 = vmatprep.subr.mxu1 %v1664_v0 }
  0xde   : > { %1372 = vmatpush3.xpose.msra.mxu0 %v383_v49  ;;  %1409 = vmatpush3.xpose.msra.mxu1 %v1865_v22 }
  0xdf   : > { %1373 = vmatprep.subr.mxu0 %v1664_v0  ;;  %1410 = vmatprep.subr.mxu1 %v1664_v0 }
  0xe2   : > { %1374 = vmatpush3.xpose.msra.mxu0 %v390_v55  ;;  %1411 = vmatpush3.xpose.msra.mxu1 %v1878_v28 }
  0xe3   : > { %1375 = vmatprep.subr.mxu0 %v1664_v0  ;;  %1412 = vmatprep.subr.mxu1 %v1664_v0 }
  0xe6   : > { %1376 = vmatpush3.xpose.msra.mxu0 %v397_v61  ;;  %1413 = vmatpush3.xpose.msra.mxu1 %v1891_v34 }
  0xe7   : > { %1377 = vmatprep.subr.mxu0 %v1664_v0  ;;  %1414 = vmatprep.subr.mxu1 %v1664_v0 }
  0xea   : > { %1378 = vmatpush3.xpose.msra.mxu0 %v404_v7  ;;  %1415 = vmatpush3.xpose.msra.mxu1 %v1904_v40 }
  0xeb   : > { %1379 = vmatprep.subr.mxu0 %v1664_v0  ;;  %1416 = vmatprep.subr.mxu1 %v1664_v0 }
  0xee   : > { %1380 = vmatpush3.xpose.msra.mxu0 %v411_v23  ;;  %1417 = vmatpush3.xpose.msra.mxu1 %v1917_v46 }
  0xef   : > { %1381 = vmatprep.subr.mxu0 %v1664_v0  ;;  %1418 = vmatprep.subr.mxu1 %v1664_v0 }
  0xf2   : > { %1382 = vmatpush3.xpose.msra.mxu0 %v2323_v4  ;;  %1419 = vmatpush3.xpose.msra.mxu1 %v1930_v52 }
  0xf3   : > { %1383 = vmatprep.subr.mxu0 %v1664_v0  ;;  %1420 = vmatprep.subr.mxu1 %v1664_v0 }
  0xf6   : > { %1384 = vmatpush3.xpose.msra.mxu0 %v2324_v5  ;;  %1421 = vmatpush3.xpose.msra.mxu1 %v1943_v58 }
  0xf7   : > { %1385 = vmatprep.subr.mxu0 %v1664_v0  ;;  %1422 = vmatprep.subr.mxu1 %v1664_v0 }
  0xfa   : > { %1386 = vmatpush3.xpose.msra.mxu0 %v2325_v6  ;;  %1423 = vmatpush3.xpose.msra.mxu1 %v1956_v1 }
  0xfb   : > { %1387 = vmatprep.subr.mxu0 %v1664_v0  ;;  %1424 = vmatprep.subr.mxu1 %v1664_v0 }
  0xfe   : > { %1388 = vmatpush3.xpose.msra.mxu0 %v439_v53  ;;  %1425 = vmatpush3.xpose.msra.mxu1 %v1969_v17 }
  0xff   : > { %1426 = vmatprep.subr.mxu1 %v1664_v0 }
 0x101   : > { %1390 = vmatmul.mubr.f32.vlgmr.msra.gmra.mxu0 %v1984_v32 }
 0x102   : > { %1427 = vmatpush3.xpose.msra.mxu1 %v1982_v30  ;;  %1392 = vmatprep.mubr.msk.f32.mxu0 %vm1665_vm0, %v1664_v0 }
 0x103   : > { %1428 = vmatprep.subr.mxu1 %v1664_v0 }
 0x105   : > { %1393 = vmatmul.mubr.f32.gmra.mxu0 %v2002_v50 }
 0x106   : > { %1429 = vmatpush3.xpose.msra.mxu1 %v1997_v47  ;;  %1395 = vmatprep.mubr.msk.f32.mxu0 %vm1665_vm0, %v1664_v0 }
 0x109   : > { %1396 = vmatmul.mubr.f32.gmra.mxu0 %v2018_v3  ;;  %1431 = vmatmul.mubr.f32.vlgmr.msra.gmra.mxu1 %v1984_v32 }
 0x10a   : > { %1433 = vmatprep.mubr.msk.f32.mxu1 %vm1665_vm0, %v1664_v0 }
 0x10d   : > { %1434 = vmatmul.mubr.f32.gmra.mxu1 %v2002_v50 }
 0x10e   : > { %1436 = vmatprep.mubr.msk.f32.mxu1 %vm1665_vm0, %v1664_v0 }
 0x111   : > { %1437 = vmatmul.mubr.f32.gmra.mxu1 %v2018_v3 }
 0x141   : > { %v307_v8 = vpop.f32.mrf.mxu0 }
 0x143   : > { %v1227_v9 = vpop.f32.mrf.mxu0 }
 0x145   : > { %v317_v10 = vpop.f32.mrf.mxu0 }
 0x147   : > { %v1230_v12 = vpop.f32.mrf.mxu0 }
 0x149   : > { %v478_v13 = vpop.f32.mrf.mxu1  ;;  %v327_v14 = vpop.f32.mrf.mxu0 }
 0x14a   : > { %v479_v15 = vadd.f32 %v478_v13, %v307_v8 }
 0x14b   : > { %v1268_v18 = vpop.f32.mrf.mxu1  ;;  %v1233_v20 = vpop.f32.mrf.mxu0 }
 0x14d   : > { %v484_v22 = vpop.f32.mrf.mxu1 }
 0x14e   : > { %v485_v25 = vadd.f32 %v484_v22, %v317_v10 }
 0x14f   : > { %v1271_v27 = vpop.f32.mrf.mxu1 }
 0x151   : > { %v490_v28 = vpop.f32.mrf.mxu1 }
 0x152   : > { %v491_v31 = vadd.f32 %v490_v28, %v327_v14 }
 0x153   : > { %v1274_v33 = vpop.f32.mrf.mxu1 }
 0x181   : > { %v594_v34 = vpop.f32.mrf.mxu0 }
 0x182   : > { %v595_v37 = vadd.f32 %v594_v34, %v479_v15 }
 0x183   : > { %v1309_v0 = vpop.f32.mrf.mxu0 }
 0x185   : > { %v601_v39 = vpop.f32.mrf.mxu0 }
 0x186   : > { %v602_v40 = vadd.f32 %v601_v39, %v485_v25 }
 0x187   : > { %v1312_v43 = vpop.f32.mrf.mxu0 }
 0x189   : > { %v608_v45 = vpop.f32.mrf.mxu0  ;;  %v697_v46 = vpop.f32.mrf.mxu1 }
 0x18a   : > { %v609_v49 = vadd.f32 %v608_v45, %v491_v31  ;;  %v698_v16 = vadd.f32 %v697_v46, %v595_v37 }
 0x18b   : > { %v1350_v51 = vpop.f32.mrf.mxu1  ;;  %v1315_v52 = vpop.f32.mrf.mxu0 }
 0x18d   : > { %v705_v55 = vpop.f32.mrf.mxu1 }
 0x18e   : > { %v706_v32 = vadd.f32 %v705_v55, %v602_v40 }
 0x18f   : > { %v1353_v57 = vpop.f32.mrf.mxu1 }
 0x191   : > { %v713_v58 = vpop.f32.mrf.mxu1 }
 0x192   : > { %v714_v56 = vadd.f32 %v713_v58, %v609_v49 }
 0x193   : > { %v1356_v61 = vpop.f32.mrf.mxu1 }
 0x1c1   : > { %v832_v63 = vpop.f32.mrf.mxu0 }
 0x1c2   : > { %v833_v23 = vadd.f32 %v832_v63, %v698_v16 }
 0x1c3   : > { %v1391_v1 = vpop.f32.mrf.mxu0 }
 0x1c5   : > { %v838_v7 = vpop.f32.mrf.mxu0 }
 0x1c6   : > { %v839_v48 = vadd.f32 %v838_v7, %v706_v32 }
 0x1c7   : > { %v1394_v17 = vpop.f32.mrf.mxu0 }
 0x1c9   : > { %v844_v26 = vpop.f32.mrf.mxu0  ;;  %v931_v30 = vpop.f32.mrf.mxu1 }
 0x1ca   : > { %v932_v38 = vadd.f32 %v931_v30, %v833_v23  ;;  %v845_v2 = vadd.f32 %v844_v26, %v714_v56 }
 0x1cb   : > { %v1432_v42 = vpop.f32.mrf.mxu1  ;;  %v1397_v47 = vpop.f32.mrf.mxu0 }
 0x1cc   : > { %947 = vst [vmem:[%s198_s19] sm:$0xff] %v932_v38 }
 0x1cd   : > { %v937_v50 = vpop.f32.mrf.mxu1 }
 0x1ce   : > { %v938_v59 = vadd.f32 %v937_v50, %v839_v48 }
 0x1cf   : > { %v1435_v62 = vpop.f32.mrf.mxu1 }
 0x1d0   : > { %948 = vst [vmem:[%s198_s19 + $0x8] sm:$0xff] %v938_v59 }
 0x1d1   : > { %v943_v3 = vpop.f32.mrf.mxu1 }
 0x1d2   : > { %v944_v21 = vadd.f32 %v943_v3, %v845_v2 }
 0x1d3   : > { %v1438_v24 = vpop.f32.mrf.mxu1 }
 0x1d4   : > { %949 = vst [vmem:[%s198_s19 + $0x10] sm:$0xff] %v944_v21 }
 0x1d5   : > { %1587 = shalt.err (!%p1584_p3)
}
 0x1d6   : > { %s1588_s3 = scalar_lea.hbm %s2258_s26, 384  ;;  %s1592_s7 = scalar_lea.hbm %s2307_s2, 1152 }
 0x1d7   : > { %p1589_p5 = scmp.ne.s32.totalorder %s2258_s26, %s1588_s3  ;;  %p1593_p9 = scmp.lt.s32.totalorder %s2258_s26, %s2307_s2 }
 0x1d8   : > { %p1594_p11 = scmp.lt.s32.totalorder %s1592_s7, %s1588_s3 }
 0x1d9   : > { %p1590_p7 = pnand %p1589_p5, %p2326_p4 }
 0x1da   : > { %p1595_p10 = por %p1594_p11, %p1593_p9 }
 0x1db   : > { %p1591_p6 = pneg %p1590_p7 }
 0x1dd   : > { %p1596_p1 = pnand %p1595_p10, %p1591_p6 }
 0x1df   : > { %1599 = shalt.err (!%p1596_p1)
}
 0x1e0   : > { %s1667_s17 = smov 128   ;;  %s1668_s19 = smov 8  }
 0x1e1   : > { %1447 = dma.vmem_to_hbm [thread:$0]  (%p2326_p4), %s2253_s21, 384, %s2258_s26, %s951_s12, %s1667_s17, %s1667_s17, %s1668_s19  }
 0x1e2 PF: > { %p1464_p8 = scmp.ge.s32.totalorder %s1658_s14, 2  ;;  %s981_s28 = sand.u32 1, %s1638_s9  }
 0x1e3   : > { %p2327_p12 = scmp.ne.s32.totalorder %s2316_s20, 0  ;;  %s982_s23 = scalar_lea.sflag [#allocation4], %s981_s28 }
 0x1e5   : > { %p1458_p13 = pnand %p1464_p8, %p2327_p12 }
 0x1e7   : > { %p1459_p0 = pneg %p1458_p13 }
 0x1e9   : > { %1633 = dma.done.wait (%p1459_p0), %s982_s23, 384  }
 0x1ea   : > { %1635 = vsyncadd (%p1459_p0), %s982_s23, 4294966912  ;;  %s19_s14 = sadd.s32 1, %s1658_s14   ;;  %s2328_s9 = smov %s1642_s10 }
 0x1eb   : > { %p16_p2 = scmp.ge.s32.totalorder %s19_s14, 5   ;;  %s2329_s10 = smov %s1646_s11 }
 0x1ec   : > { %s2330_s11 = smov %s1782_s15  ;;  %s2331_s12 = smov %s1654_s13 }
 0x1ed   : > { %s2332_s13 = smov %s2334_s25  ;;  %18 = sbr.rel (!%p16_p2) target bundleno = 7 (0x7), region = 79 }
 0x1f2   :  { %987 = vsyncpa [#allocation3], 1 }
 0x1f3   :  { %989 = vsyncpa [#allocation3 + $0x1], 1 }
 0x1f4   :  { %990 = vsyncpa [#allocation6], 1 }
 0x1f5   :  { %992 = vsyncpa [#allocation6 + $0x1], 1 }
 0x1f6   :  { %993 = vsyncpa [#allocation4], 1 }
 0x1f7   :  { %995 = vsyncpa [#allocation4 + $0x1], 1 }

</bundles_post_ra>
